<compile_context>
chip_gen: v7x
topology: tpu7x:2x2x1
jax: 0.10.0
libtpu: 0.0.40
codegen_flags: <defaults>
</compile_context>

<pallas_src>
import math
from functools import partial

import jax
import jax.numpy as jnp
from jax.experimental import pallas as pl
from jax.experimental.pallas import tpu as pltpu


def _cdiv(a, b):
    return (a + b - 1) // b


def _round_up(a, m):
    return _cdiv(a, m) * m


# ---------------------------------------------------------------------------
# Kernels
# ---------------------------------------------------------------------------

def _packed_kernel(x_ref, freq_ref, sel_ref, out_ref):
    """dim <= 128 path: P = 128 // dim rows packed per 128-lane line.

    x_ref:    (TB, 128) f32 - lane l holds the timestep of packed row (l // dim)
    freq_ref: (1, 128)  f32 - per-lane frequency, [freqs, freqs] repeated P times
    sel_ref:  (1, 128)  f32 - 0.0 on sin lanes, 1.0 on cos lanes
    out_ref:  (TB, 128) f32 - single unmasked, lane-dense store
    """
    emb = x_ref[...] * freq_ref[...]
    sel = sel_ref[...]
    # Exact blend: sel is exactly 0.0 or 1.0, so each lane is exactly sin or cos.
    out_ref[...] = jnp.sin(emb) * (1.0 - sel) + jnp.cos(emb) * sel


def _wide_kernel(x_ref, freq_ref, out_ref, *, half_dim, aligned_halves):
    """dim > 128 (or 128 % dim != 0) path.

    x_ref:    (TB, 1)          f32
    freq_ref: (1, half_dim)    f32
    out_ref:  (TB, 2*half_dim) f32
    """
    emb = x_ref[...] * freq_ref[...]
    s = jnp.sin(emb)
    c = jnp.cos(emb)
    if aligned_halves:
        # half_dim % 128 == 0: both slice stores are lane-aligned full stores.
        out_ref[:, :half_dim] = s
        out_ref[:, half_dim:] = c
    else:
        # one lane-dense full-width row store instead of two masked partials.
        out_ref[...] = jnp.concatenate([s, c], axis=-1)


# ---------------------------------------------------------------------------
# Wrapper
# ---------------------------------------------------------------------------

def _pick_row_tile(rows, out_row_bytes, in_row_bytes,
                   *, vmem_budget_bytes=6 << 20, max_tile=2048):
    # Double-buffered input + output blocks must stay well under the scoped
    # VMEM limit on every generation (v5e default 16 MiB, v7x physical 64 MiB).
    per_row = 2 * (out_row_bytes + in_row_bytes)
    tb_budget = max(8, (vmem_budget_bytes // per_row) // 8 * 8)
    # Guarantee >= 2 grid steps when there are enough rows (v7x second core,
    # pipeline overlap).  Below 16 rows a single/tiny-step grid is unavoidable.
    tb_split = _round_up(_cdiv(rows, 2), 8) if rows >= 16 else 8
    return max(8, min(max_tile, tb_budget, tb_split))


def sinusoidal_pos_emb(x, dim):
    """x: (B,) array of timesteps. Returns (B, dim) float32 embedding."""
    assert dim % 2 == 0, "dim must be even"
    assert dim >= 4, "dim must be >= 4 (half_dim - 1 == 0 otherwise)"
    half_dim = dim // 2
    scale = math.log(10000.0) / (half_dim - 1)

    B = x.shape[0]
    x = x.astype(jnp.float32)
    # Hoisted frequency table (constant-folds in XLA; kernel does no exp()).
    freqs = jnp.exp(jnp.arange(half_dim, dtype=jnp.float32) * (-scale))

    compiler_params = pltpu.CompilerParams(dimension_semantics=("parallel",))

    if 128 % dim == 0:
        # ------------------- packed path (dim <= 128) -------------------
        P = 128 // dim                       # rows packed per 128-lane line
        B_eff = _round_up(B, P)
        rows = B_eff // P
        rows_pad = max(rows, 8)              # block sublane dim must be >= 8

        x_eff = x if B_eff == B else jnp.pad(x, (0, B_eff - B))
        x_rep = jnp.repeat(x_eff, dim).reshape(rows, 128)
        if rows_pad != rows:
            x_rep = jnp.pad(x_rep, ((0, rows_pad - rows), (0, 0)))

        freq_rep = jnp.tile(jnp.concatenate([freqs, freqs]), P).reshape(1, 128)
        sel_rep = jnp.tile(
            jnp.concatenate([jnp.zeros(half_dim, jnp.float32),
                             jnp.ones(half_dim, jnp.float32)]), P
        ).reshape(1, 128)

        TB = _pick_row_tile(rows_pad, out_row_bytes=512, in_row_bytes=512)
        grid = (_cdiv(rows_pad, TB),)        # overhanging last block is masked

        out = pl.pallas_call(
            _packed_kernel,
            out_shape=jax.ShapeDtypeStruct((rows_pad, 128), jnp.float32),
            grid=grid,
            in_specs=[
                pl.BlockSpec((TB, 128), lambda i: (i, 0)),
                pl.BlockSpec((1, 128), lambda i: (0, 0)),
                pl.BlockSpec((1, 128), lambda i: (0, 0)),
            ],
            out_specs=pl.BlockSpec((TB, 128), lambda i: (i, 0)),
            compiler_params=compiler_params,
        )(x_rep, freq_rep, sel_rep)

        out = out.reshape(rows_pad * P, dim)     # free row-major reshape
        if rows_pad * P != B:                    # only when B % P != 0 or B < 8
            out = out[:B]
        return out

    # ------------- wide path (dim > 128, or 128 % dim != 0) -------------
    rows = B
    rows_pad = max(rows, 8)
    x2d = x.reshape(B, 1)
    if rows_pad != rows:
        x2d = jnp.pad(x2d, ((0, rows_pad - rows), (0, 0)))
    freqs2d = freqs.reshape(1, half_dim)

    out_row_bytes = _round_up(dim, 128) * 4
    TB = _pick_row_tile(rows_pad, out_row_bytes=out_row_bytes, in_row_bytes=512)
    grid = (_cdiv(rows_pad, TB),)

    kernel = partial(_wide_kernel, half_dim=half_dim,
                     aligned_halves=(half_dim % 128 == 0))
    out = pl.pallas_call(
        kernel,
        out_shape=jax.ShapeDtypeStruct((rows_pad, dim), jnp.float32),
        grid=grid,
        in_specs=[
            pl.BlockSpec((TB, 1), lambda i: (i, 0)),
            pl.BlockSpec((1, half_dim), lambda i: (0, 0)),
        ],
        out_specs=pl.BlockSpec((TB, dim), lambda i: (i, 0)),
        compiler_params=compiler_params,
    )(x2d, freqs2d)

    if rows_pad != rows:                         # only when B < 8
        out = out[:B]
    return out


# ---------------------------------------------------------------------------
# Reference + self-test
# ---------------------------------------------------------------------------

def _reference(x, dim):
    half_dim = dim // 2
    scale = math.log(10000.0) / (half_dim - 1)
    freqs = jnp.exp(jnp.arange(half_dim, dtype=jnp.float32) * (-scale))
    emb = x.astype(jnp.float32)[:, None] * freqs[None, :]
    return jnp.concatenate([jnp.sin(emb), jnp.cos(emb)], axis=-1)


if __name__ == "__main__":
    key = jax.random.PRNGKey(0)
    # (B, dim) cases covering: packed small-batch, packed large-batch with a
    # partial last grid block, aligned two-slice wide path, concat wide path.
    cases = [(8, 32), (1000, 64), (16, 256), (16, 192)]
    for idx, (B, dim) in enumerate(cases):
        x = jax.random.uniform(jax.random.fold_in(key, idx), (B,),
                               dtype=jnp.float32, minval=0.0, maxval=1000.0)
        out = jax.block_until_ready(sinusoidal_pos_emb(x, dim))
        ref = _reference(x, dim)
        assert out.shape == (B, dim), (out.shape, B, dim)
        # fp32 trig at arguments up to ~1000: allow a few ULP of slack between
        # the Mosaic and XLA sin/cos implementations.
        assert jnp.allclose(out, ref, atol=2e-4, rtol=1e-4), \
            f"mismatch for B={B}, dim={dim}"
    print("KERNEL_OK")
</pallas_src>

<mosaic_0001>
module attributes {stable_mosaic.version = 11 : i64} {
  func.func @_packed_kernel(%arg0: i32, %arg1: memref<8x128xf32, #tpu.memory_space<vmem>>, %arg2: memref<1x128xf32, #tpu.memory_space<vmem>>, %arg3: memref<1x128xf32, #tpu.memory_space<vmem>>, %arg4: memref<8x128xf32, #tpu.memory_space<vmem>>) attributes {dimension_semantics = [#tpu.dimension_semantics<parallel>], iteration_bounds = array<i64: 1>, scalar_prefetch = 0 : i64, scratch_operands = 0 : i64, tpu.core_type = #tpu.core_type<tc>, window_params = [{transform_indices = @transform_0, window_bounds = array<i64: 8, 128>}, {pipeline_mode = #tpu.pipeline_mode<synchronous>, transform_indices = @transform_1, window_bounds = array<i64: 1, 128>}, {pipeline_mode = #tpu.pipeline_mode<synchronous>, transform_indices = @transform_2, window_bounds = array<i64: 1, 128>}, {transform_indices = @transform_3, window_bounds = array<i64: 8, 128>}]} {
    %c0 = arith.constant 0 : index
    %c0_0 = arith.constant 0 : index
    %0 = vector.load %arg1[%c0, %c0_0] : memref<8x128xf32, #tpu.memory_space<vmem>>, vector<8x128xf32>
    %c0_1 = arith.constant 0 : index
    %c0_2 = arith.constant 0 : index
    %1 = vector.load %arg2[%c0_1, %c0_2] : memref<1x128xf32, #tpu.memory_space<vmem>>, vector<1x128xf32>
    %2 = vector.broadcast %1 : vector<1x128xf32> to vector<8x128xf32>
    %3 = arith.mulf %0, %2 : vector<8x128xf32>
    %c0_3 = arith.constant 0 : index
    %c0_4 = arith.constant 0 : index
    %4 = vector.load %arg3[%c0_3, %c0_4] : memref<1x128xf32, #tpu.memory_space<vmem>>, vector<1x128xf32>
    %5 = math.sin %3 : vector<8x128xf32>
    %cst = arith.constant 1.000000e+00 : f32
    %6 = vector.broadcast %cst : f32 to vector<1x128xf32>
    %7 = arith.subf %6, %4 : vector<1x128xf32>
    %8 = vector.broadcast %7 : vector<1x128xf32> to vector<8x128xf32>
    %9 = arith.mulf %5, %8 : vector<8x128xf32>
    %10 = math.cos %3 : vector<8x128xf32>
    %11 = vector.broadcast %4 : vector<1x128xf32> to vector<8x128xf32>
    %12 = arith.mulf %10, %11 : vector<8x128xf32>
    %13 = arith.addf %9, %12 : vector<8x128xf32>
    %c0_5 = arith.constant 0 : index
    %c0_6 = arith.constant 0 : index
    %14 = vector.load %arg4[%c0_5, %c0_6] : memref<8x128xf32, #tpu.memory_space<vmem>>, vector<8x128xf32>
    tpu.vector_store %arg4[%c0_5, %c0_6], %13 {strides = array<i32>} : memref<8x128xf32, #tpu.memory_space<vmem>>, vector<8x128xf32>,
    return
  }
  func.func @transform_0(%arg0: i32) -> (i32, i32) {
    %c0_i32 = arith.constant 0 : i32
    %c0_i32_0 = arith.constant 0 : i32
    return %arg0, %c0_i32 : i32, i32
  }
  func.func @transform_1(%arg0: i32) -> (i32, i32) {
    %c0_i32 = arith.constant 0 : i32
    %c0_i32_0 = arith.constant 0 : i32
    %c0_i32_1 = arith.constant 0 : i32
    return %c0_i32, %c0_i32_0 : i32, i32
  }
  func.func @transform_2(%arg0: i32) -> (i32, i32) {
    %c0_i32 = arith.constant 0 : i32
    %c0_i32_0 = arith.constant 0 : i32
    %c0_i32_1 = arith.constant 0 : i32
    return %c0_i32, %c0_i32_0 : i32, i32
  }
  func.func @transform_3(%arg0: i32) -> (i32, i32) {
    %c0_i32 = arith.constant 0 : i32
    %c0_i32_0 = arith.constant 0 : i32
    return %arg0, %c0_i32 : i32, i32
  }
}

</mosaic_0001>

<bundles_post_ra>
// kernel: tpu_custom_call.1
= control target key start
LH: loop header
LB: loop body
LE: loop exit
PB: predicated region body
PF: predicated region fallthrough
CT: control target
= control target key end

     0   :  { %8 = vsyncpa [#allocation3], 0  ;;  %s428_s0 = inlined_call_operand.hbm [shape: f32[8,128], index: 0, kind: input, shape index: {}]   ;;  %s429_s1 = inlined_call_operand.vmem [shape: f32[1,128], index: 1, kind: input, shape index: {}]   ;;  %s430_s2 = inlined_call_operand.vmem [shape: f32[1,128], index: 2, kind: input, shape index: {}]   ;;  %s431_s3 = inlined_call_operand.hbm [shape: f32[8,128], index: 3, kind: output, shape index: {}]  }
   0x1   :  { %9 = vsyncpa [#allocation4], 0  ;;  %s349_s12 = smov [#allocation2]   ;;  %s301_s16 = scalar_lea.hbm %s428_s0, 128 }
   0x2   :  { %s16_s13 = sshll.u32 %s349_s12, 4  ;;  %p302_p0 = scmp.ne.s32.totalorder %s428_s0, %s301_s16  ;;  %s17_s13 = int_to_ptr.vmem [resolvable:$true] %s16_s13 }
   0x3   :  { %p305_p1 = scmp.lt.u32.totalorder %s301_s16, %s428_s0 }
   0x5   :  { %p307_p2 = pnand %p305_p1, %p302_p0 }
   0x7   :  { %310 = shalt.err (!%p307_p2)
}
   0x8   :  { %s311_s21 = scalar_lea.vmem %s17_s13, 128  ;;  %p316_p4 = scmp.lt.s32.totalorder %s17_s13, %s17_s13 }
   0x9   :  { %p312_p3 = scmp.ne.s32.totalorder %s17_s13, %s311_s21  ;;  %p317_p5 = scmp.lt.s32.totalorder %s311_s21, %s311_s21 }
   0xb   :  { %p318_p6 = por %p317_p5, %p316_p4 }
   0xd   :  { %p319_p7 = pnand %p318_p6, %p312_p3 }
   0xf   :  { %322 = shalt.err (!%p319_p7)
}
  0x10   :  { %19 = dma.hbm_to_vmem [thread:$0]  %s428_s0, 128, %s17_s13, [#allocation3]  }
  0x11   :  { %345 = dma.done.wait [#allocation3], 128  }
  0x12   :  { %346 = vsyncadd [#allocation3], 4294967168  ;;  %v27_v0 = vld [vmem:[#allocation2] sm:$0xff]  ;;  %v350_v14 = vmov 683565275  }
  0x13   :  { %v276_v1 = vld [vmem:[%s429_s1] ss:$0 sm:$0xff]  ;;  %v351_v16 = vmov 2475754826   ;;  %v352_v18 = vmov 2131351028  }
  0x14   :  { %v392_v2 = vmul.f32 %v276_v1, %v27_v0  ;;  %v353_v20 = vmov 2102212464   ;;  %v354_v22 = vmov 920167782   ;;  %v355_v29 = vmov 1326507024  }
  0x16   :  { %v40_v3 = vand.u32 2139095040, %v392_v2  ;;  %v37_v5 = vand.u32 2147483647, %v392_v2  ;;  %vm39_vm7 = vcmp.lt.s32.totalorder %v392_v2, 0  ;;  %vm129_vm15 = vweird.f32 %v392_v2 }
  0x18   :  { %v41_v4 = vshrl.u32 %v40_v3, 23  ;;  %v44_v8 = vand.u32 8388607, %v37_v5  ;;  %vm38_vm8 = vcmp.le.f32.partialorder %v37_v5, 0.7853982 }
  0x1a   :  { %v277_v6 = vadd.s32 4294967169, %v41_v4  ;;  %v45_v11 = vor.u32 8388608, %v44_v8 }
  0x1c   :  { %v47_v7 = vadd.s32 1, %v277_v6  ;;  %v85_v31 = vshll.u32 %v45_v11, 8 }
  0x1e   :  { %vm48_vm0 = vcmp.gt.s32.totalorder %v47_v7, 0 }
  0x1f   :  { %v49_v9 = vsel %vm48_vm0, %v47_v7, 0 }
  0x20   :  { %v51_v10 = vand.u32 31, %v49_v9  ;;  %v50_v12 = vshrl.u32 %v49_v9, 5 }
  0x22   :  { %v52_v13 = vsub.s32 32, %v51_v10  ;;  %v54_v15 = vshll.u32 %v350_v14, %v51_v10  ;;  %v57_v17 = vshll.u32 %v351_v16, %v51_v10  ;;  %v60_v19 = vshll.u32 %v352_v18, %v51_v10 }
  0x23   :  { %v63_v21 = vshll.u32 %v353_v20, %v51_v10  ;;  %v66_v23 = vshll.u32 %v354_v22, %v51_v10  ;;  %vm69_vm1 = vcmp.lt.s32.totalorder %v50_v12, 1  ;;  %vm72_vm2 = vcmp.lt.s32.totalorder %v50_v12, 4 }
  0x24   :  { %v53_v24 = vshrl.u32 %v350_v14, %v52_v13  ;;  %v55_v25 = vshrl.u32 %v351_v16, %v52_v13  ;;  %v58_v26 = vshrl.u32 %v352_v18, %v52_v13  ;;  %v61_v27 = vshrl.u32 %v353_v20, %v52_v13 }
  0x25   :  { %v64_v28 = vshrl.u32 %v354_v22, %v52_v13  ;;  %v67_v30 = vshrl.u32 %v355_v29, %v52_v13  ;;  %vm70_vm3 = vcmp.lt.s32.totalorder %v50_v12, 2  ;;  %vm71_vm4 = vcmp.lt.s32.totalorder %v50_v12, 3 }
  0x26   :  { %v56_v32 = vor.u32 %v55_v25, %v54_v15  ;;  %v59_v33 = vor.u32 %v58_v26, %v57_v17  ;;  %v62_v34 = vor.u32 %v61_v27, %v60_v19  ;;  %v143_v22 = vlaneseq  ;;  %v36_v25 = vld [vmem:[%s430_s2] sm:$0x1]  ;;  %s356_s2 = smov [#allocation5]  }
  0x27   :  { %v65_v35 = vor.u32 %v64_v28, %v63_v21  ;;  %v68_v36 = vor.u32 %v67_v30, %v66_v23  ;;  %v141_v29 = vsub.f32 1.0, %v36_v25  ;;  %s267_s26 = sshll.u32 %s356_s2, 4  ;;  %s268_s26 = int_to_ptr.vmem [resolvable:$true] %s267_s26 }
  0x28   :  { %v73_v37 = vsel %vm69_vm1, %v53_v24, %v56_v32  ;;  %v74_v38 = vsel %vm72_vm2, %v62_v34, 2102212464  ;;  %v77_v39 = vsel %vm69_vm1, %v56_v32, %v59_v33  ;;  %v81_v40 = vsel %vm69_vm1, %v59_v33, %v62_v34  ;;  %s323_s27 = scalar_lea.vmem %s268_s26, 128  ;;  %p328_p9 = scmp.lt.s32.totalorder %s268_s26, %s268_s26 }
  0x29   :  { %v75_v41 = vsel %vm71_vm4, %v59_v33, %v74_v38  ;;  %v78_v42 = vsel %vm72_vm2, %v65_v35, 920167782  ;;  %v82_v43 = vsel %vm72_vm2, %v68_v36, 1326507024  ;;  %v144_v24 = vshrl.u32 %v143_v22, 7  ;;  %p324_p8 = scmp.ne.s32.totalorder %s268_s26, %s323_s27  ;;  %p329_p10 = scmp.lt.s32.totalorder %s323_s27, %s323_s27 }
  0x2a   :  { %v79_v44 = vsel %vm71_vm4, %v62_v34, %v78_v42  ;;  %v83_v45 = vsel %vm71_vm4, %v65_v35, %v82_v43  ;;  %v76_v46 = vsel %vm70_vm3, %v73_v37, %v75_v41 }
  0x2b   :  { %v80_v47 = vsel %vm70_vm3, %v77_v39, %v79_v44  ;;  %v84_v48 = vsel %vm70_vm3, %v81_v40, %v83_v45  ;;  %v92_v53 = vmul.u32 %v85_v31, %v76_v46  ;;  %v145_v28 = vsub.s32 0, %v144_v24  ;;  %p330_p11 = por %p329_p10, %p328_p9 }
  0x2c   :  { %v398_v49 = vmul.u32.u64.low %v85_v31, %v84_v48  ;;  %v399_v50 = vmul.u32.u64.high %v85_v31, %v84_v48, %v398_v49  ;;  %v401_v51 = vmul.u32.u64.low %v85_v31, %v80_v47  ;;  %v402_v52 = vmul.u32.u64.high %v85_v31, %v80_v47, %v401_v51 }
  0x2d   :  { %v256_v33 = vrot.slane %v36_v25, %v145_v28  ;;  %v146_v35 = vrot.slane %v141_v29, %v145_v28  ;;  %p331_p12 = pnand %p330_p11, %p324_p8 }
  0x2e   :  { %vm94_vm5 = vc.u32 %v399_v50, %v401_v51  ;;  %v95_v54 = vadd.s32 1, %v402_v52  ;;  %v93_v1 = vadd.s32 %v401_v51, %v399_v50 }
  0x30   :  { %v96_v55 = vsel %vm94_vm5, %v95_v54, %v402_v52 }
  0x31   :  { %v97_v56 = vadd.s32 %v96_v55, %v92_v53 }
  0x33   :  { %v98_v57 = vadd.s32 536870912, %v97_v56 }
  0x35   :  { %v99_v58 = vshrl.u32 %v98_v57, 30 }
  0x37   :  { %v100_v59 = vshll.u32 %v99_v58, 30  ;;  %v123_v15 = vsub.s32 4, %v99_v58 }
  0x39   :  { %v101_v60 = vsub.s32 %v97_v56, %v100_v59  ;;  %v124_v18 = vsel %vm39_vm7, %v123_v15, %v99_v58 }
  0x3a   :  { %v126_v21 = vsel %vm38_vm8, 0, %v124_v18 }
  0x3b   :  { %v103_v61 = vsub.s32 0, %v101_v60  ;;  %v130_v23 = vadd.s32 3, %v126_v21  ;;  %v242_v27 = vand.u32 3, %v126_v21 }
  0x3d   :  { %v278_v62 = vmin.u32 %v103_v61, %v101_v60  ;;  %v131_v26 = vand.u32 3, %v130_v23  ;;  %vm247_vm10 = vcmp.eq.s32.totalorder %v242_v27, 2  ;;  %vm244_vm12 = vcmp.eq.s32.totalorder %v242_v27, 0 }
  0x3e   :  { %vm243_vm14 = vcmp.lt.s32.totalorder %v242_v27, 2 }
  0x3f   :  { %v105_v63 = vclz %v278_v62  ;;  %vm136_vm9 = vcmp.eq.s32.totalorder %v131_v26, 2  ;;  %vm133_vm11 = vcmp.eq.s32.totalorder %v131_v26, 0  ;;  %vm132_vm13 = vcmp.lt.s32.totalorder %v131_v26, 2 }
  0x41   :  { %v279_v0 = vadd.s32 4294967294, %v105_v63 }
  0x43   :  { %vm280_vm6 = vcmp.lt.s32.totalorder %v279_v0, 0 }
  0x44   :  { %v108_v3 = vsel %vm280_vm6, 0, %v279_v0 }
  0x45   :  { %v109_v4 = vsub.s32 32, %v108_v3  ;;  %v110_v6 = vshll.u32 %v101_v60, %v108_v3  ;;  %v113_v7 = vsub.s32 4294967266, %v108_v3 }
  0x47   :  { %v111_v8 = vshrl.u32 %v93_v1, %v109_v4  ;;  %v114_v9 = vadd.s32 127, %v113_v7 }
  0x49   :  { %v112_v10 = vor.u32 %v111_v8, %v110_v6  ;;  %v115_v11 = vshll.u32 %v114_v9, 23 }
  0x4b   :  { %v116_v12 = vor.u32 4788187, %v115_v11  ;;  %v119_v13 = vcvt.s32.f32 %v112_v10 }
  0x4d   :  { %v117_v14 = vand.u32 2147483647, %v116_v12 }
  0x4f   :  { %v120_v16 = vmul.f32 %v119_v13, %v117_v14 }
  0x51   :  { %v121_v17 = vxor.u32 2147483648, %v120_v16 }
  0x53   :  { %v122_v19 = vsel %vm39_vm7, %v121_v17, %v120_v16 }
  0x54   :  { %v125_v20 = vsel %vm38_vm8, %v392_v2, %v122_v19 }
  0x55   :  { %297 = vcosq.f32 %v125_v20 }
  0x56   :  { %299 = vsinq.f32 %v125_v20 }
  0x5f   :  { %v298_v5 = vpop.eup %297 }
  0x60   :  { %v300_v30 = vpop.eup %299  ;;  %v137_v31 = vxor.u32 2147483648, %v298_v5 }
  0x61   :  { %v134_v32 = vxor.u32 2147483648, %v300_v30 }
  0x62   :  { %v138_v34 = vsel %vm136_vm9, %v137_v31, %v300_v30  ;;  %v249_v36 = vsel %vm247_vm10, %v137_v31, %v300_v30 }
  0x63   :  { %v135_v37 = vsel %vm133_vm11, %v298_v5, %v134_v32  ;;  %v246_v38 = vsel %vm244_vm12, %v298_v5, %v134_v32 }
  0x64   :  { %v139_v39 = vsel %vm132_vm13, %v135_v37, %v138_v34  ;;  %v250_v40 = vsel %vm243_vm14, %v246_v38, %v249_v36 }
  0x65   :  { %v140_v41 = vsel %vm129_vm15, nan, %v139_v39  ;;  %v251_v42 = vsel %vm129_vm15, nan, %v250_v40 }
  0x66   :  { %v148_v43 = vmul.f32 %v146_v35, %v140_v41  ;;  %v258_v44 = vmul.f32 %v256_v33, %v251_v42 }
  0x68   :  { %v259_v45 = vadd.f32 %v258_v44, %v148_v43 }
  0x6a   :  { %260 = vst [vmem:[#allocation5] sm:$0xff] %v259_v45 }
  0x6b   :  { %334 = shalt.err (!%p331_p12)
}
  0x6c   :  { %s335_s30 = scalar_lea.hbm %s431_s3, 128 }
  0x6d   :  { %p336_p13 = scmp.ne.s32.totalorder %s431_s3, %s335_s30  ;;  %p339_p0 = scmp.lt.u32.totalorder %s335_s30, %s431_s3 }
  0x6f   :  { %p341_p1 = pnand %p339_p0, %p336_p13 }
  0x71   :  { %344 = shalt.err (!%p341_p1)
}
  0x72   :  { %270 = dma.vmem_to_hbm [thread:$0]  %s268_s26, 128, %s431_s3, [#allocation4]  }
  0x73   :  { %347 = dma.done.wait [#allocation4], 128  }
  0x74   :  { %348 = vsyncadd [#allocation4], 4294967168 }
  0x75   :  { %274 = vsyncpa [#allocation3], 1 }
  0x76   :  { %275 = vsyncpa [#allocation4], 1 }

</bundles_post_ra>
